<compile_context>
chip_gen: v6e
topology: v6e:2x2x1
jax: 0.10.0
libtpu: 0.0.40
codegen_flags: <defaults>
</compile_context>

<pallas_src>
import jax
import jax.numpy as jnp
from jax.experimental import pallas as pl
from jax.experimental.pallas import tpu as pltpu


def _cdiv(a: int, b: int) -> int:
    return -(-a // b)


def _round_up(a: int, m: int) -> int:
    return _cdiv(a, m) * m


def _div3_kernel(x_ref, o_ref):
    x = x_ref[...]
    if x.dtype != o_ref.dtype:
        # Fused int/bool -> float promotion (torch true-division semantics).
        x = x.astype(o_ref.dtype)
    o_ref[...] = x / jnp.array(3, dtype=o_ref.dtype)


def _div3_pallas(flat: jax.Array, out_dtype) -> jax.Array:
    """Run the streaming kernel on a 1-D array whose size is a multiple of 128."""
    n = flat.shape[0]
    in_item = jnp.dtype(flat.dtype).itemsize
    out_item = jnp.dtype(out_dtype).itemsize

    # Widest lane count that divides n -> fully lane-dense, unmasked stores.
    lanes = 128
    for cand in (1024, 512, 256, 128):
        if n % cand == 0:
            lanes = cand
            break
    rows = n // lanes
    x2d = jnp.reshape(flat, (rows, lanes))

    # Native packed sublane tile covering both in & out dtypes
    # (8 rows for 32-bit, 16 for 16-bit, 32 for 8-bit).
    sub = max(8, 32 // max(1, min(in_item, out_item, 4)))

    # ~4 MiB blocks sized on the wider of the in/out dtypes.
    TARGET_BLOCK_BYTES = 4 * 1024 * 1024
    big_item = max(in_item, out_item)
    block_rows = max(sub, (TARGET_BLOCK_BYTES // (lanes * big_item)) // sub * sub)

    if block_rows >= rows:
        if rows >= 4 * sub:
            # Mid-size input: still split >= 4 ways so the pipeline overlaps
            # DMA/compute and megacore (v7x) can shard the parallel axis.
            block_rows = _round_up(_cdiv(rows, 4), sub)
        else:
            # Tiny input: single full-extent block (always a legal shape).
            block_rows = rows
    grid = (_cdiv(rows, block_rows),)  # ragged last block is masked by Pallas

    out2d = pl.pallas_call(
        _div3_kernel,
        out_shape=jax.ShapeDtypeStruct((rows, lanes), out_dtype),
        grid_spec=pltpu.PrefetchScalarGridSpec(
            num_scalar_prefetch=0,
            grid=grid,
            in_specs=[pl.BlockSpec((block_rows, lanes), lambda i: (i, 0))],
            out_specs=pl.BlockSpec((block_rows, lanes), lambda i: (i, 0)),
        ),
        compiler_params=pltpu.CompilerParams(
            dimension_semantics=("parallel",),
            vmem_limit_bytes=48 * 1024 * 1024,
        ),
    )(x2d)
    return jnp.reshape(out2d, (n,))


def tensor_constant_forward(a: jax.Array) -> jax.Array:
    """Equivalent of TensorConstant().forward(a) == a / 3 (true division)."""
    orig_shape = a.shape

    # torch `a / torch.tensor(3)` promotes int/bool to the default float
    # dtype (float32); the cast itself happens inside the kernel.
    if a.dtype == jnp.bool_:
        a = a.astype(jnp.int8)  # rare; keeps streamed bytes at 1 B/elem
    is_int = jnp.issubdtype(a.dtype, jnp.integer)
    out_dtype = jnp.float32 if is_int else a.dtype

    n = int(a.size)
    if n == 0:
        return jnp.zeros(orig_shape, out_dtype)

    flat = jnp.reshape(a, (n,))
    n_main = (n // 128) * 128

    if n_main == 0:
        # < 128 elements: not worth a kernel launch.
        out = flat.astype(out_dtype) / jnp.array(3, dtype=out_dtype)
        return jnp.reshape(out, orig_shape)

    main = flat if n_main == n else flat[:n_main]
    out_main = _div3_pallas(main, out_dtype)

    if n_main == n:
        return jnp.reshape(out_main, orig_shape)

    # Ragged tail (< 128 elements): trivial jnp op on the remainder, then
    # stitch.  Only rare non-128-divisible sizes pay this; no full-array
    # pad/slice is ever materialized.
    tail = flat[n_main:].astype(out_dtype) / jnp.array(3, dtype=out_dtype)
    return jnp.reshape(jnp.concatenate([out_main, tail]), orig_shape)


if __name__ == "__main__":
    key = jax.random.PRNGKey(0)

    # Main check: small float32 tensor (divisible path).
    x = jax.random.normal(key, (2, 4, 16, 16), dtype=jnp.float32)
    out = jax.block_until_ready(tensor_constant_forward(x))
    expected = x / 3.0
    assert out.shape == x.shape and out.dtype == x.dtype
    assert jnp.allclose(out, expected, atol=1e-6, rtol=1e-6)

    # Integer input: promotion to float32 fused into the kernel.
    xi = jax.random.randint(key, (4, 64), -50, 50, dtype=jnp.int32)
    outi = jax.block_until_ready(tensor_constant_forward(xi))
    assert outi.dtype == jnp.float32
    assert jnp.allclose(outi, xi.astype(jnp.float32) / 3.0, atol=1e-6, rtol=1e-6)

    # Ragged size: kernel on 128-divisible prefix + jnp tail.
    xr = jax.random.normal(key, (1, 300), dtype=jnp.float32)
    outr = jax.block_until_ready(tensor_constant_forward(xr))
    assert outr.shape == xr.shape
    assert jnp.allclose(outr, xr / 3.0, atol=1e-6, rtol=1e-6)

    print("KERNEL_OK")
</pallas_src>

<mosaic_0001>
module attributes {stable_mosaic.version = 11 : i64} {
  func.func @_div3_kernel(%arg0: i32, %arg1: memref<2x1024xf32, #tpu.memory_space<vmem>>, %arg2: memref<2x1024xf32, #tpu.memory_space<vmem>>) attributes {dimension_semantics = [#tpu.dimension_semantics<parallel>], iteration_bounds = array<i64: 1>, scalar_prefetch = 0 : i64, scratch_operands = 0 : i64, tpu.core_type = #tpu.core_type<tc>, window_params = [{transform_indices = @transform_0, window_bounds = array<i64: 2, 1024>}, {transform_indices = @transform_1, window_bounds = array<i64: 2, 1024>}]} {
    %c0 = arith.constant 0 : index
    %c0_0 = arith.constant 0 : index
    %0 = vector.load %arg1[%c0, %c0_0] : memref<2x1024xf32, #tpu.memory_space<vmem>>, vector<2x1024xf32>
    %cst = arith.constant 3.000000e+00 : f32
    %1 = vector.broadcast %cst : f32 to vector<2x1024xf32>
    %2 = arith.divf %0, %1 : vector<2x1024xf32>
    %c0_1 = arith.constant 0 : index
    %c0_2 = arith.constant 0 : index
    %3 = vector.load %arg2[%c0_1, %c0_2] : memref<2x1024xf32, #tpu.memory_space<vmem>>, vector<2x1024xf32>
    tpu.vector_store %arg2[%c0_1, %c0_2], %2 {strides = array<i32>} : memref<2x1024xf32, #tpu.memory_space<vmem>>, vector<2x1024xf32>,
    return
  }
  func.func @transform_0(%arg0: i32) -> (i32, i32) {
    %c0_i32 = arith.constant 0 : i32
    %c0_i32_0 = arith.constant 0 : i32
    return %arg0, %c0_i32 : i32, i32
  }
  func.func @transform_1(%arg0: i32) -> (i32, i32) {
    %c0_i32 = arith.constant 0 : i32
    %c0_i32_0 = arith.constant 0 : i32
    return %arg0, %c0_i32 : i32, i32
  }
}

</mosaic_0001>

<bundles_post_ra>
// kernel: tpu_custom_call.1
= control target key start
LH: loop header
LB: loop body
LE: loop exit
PB: predicated region body
PF: predicated region fallthrough
CT: control target
= control target key end

     0   :  { %6 = vsyncpa [#allocation3], 0  ;;  %s107_s0 = inlined_call_operand.hbm [shape: f32[2,1024], index: 0, kind: input, shape index: {}]   ;;  %s108_s1 = inlined_call_operand.hbm [shape: f32[2,1024], index: 1, kind: output, shape index: {}]  }
   0x1   :  { %7 = vsyncpa [#allocation4], 0  ;;  %s89_s6 = smov [#allocation2]  }
   0x2   :  { %s14_s7 = sshll.u32 %s89_s6, 4  ;;  %s15_s7 = int_to_ptr.vmem [resolvable:$true] %s14_s7 }
   0x3   :  { %s53_s8 = scalar_lea.vmem %s15_s7, 256  ;;  %p58_p1 = scmp.lt.s32.totalorder %s15_s7, %s15_s7 }
   0x4   :  { %p54_p0 = scmp.ne.s32.totalorder %s15_s7, %s53_s8  ;;  %p59_p2 = scmp.lt.s32.totalorder %s53_s8, %s53_s8 }
   0x6   :  { %p60_p3 = por %p59_p2, %p58_p1 }
   0x8   :  { %p61_p4 = pnand %p60_p3, %p54_p0 }
   0xa   :  { %64 = shalt.err (!%p61_p4)
}
   0xb   :  { %17 = dma.hbm_to_vmem [thread:$0]  %s107_s0, 256, %s15_s7, [#allocation3]  }
   0xc   :  { %85 = dma.done.wait [#allocation3], 256  }
   0xd   :  { %86 = vsyncadd [#allocation3], 4294967040  ;;  %s90_s11 = smov [#allocation5]   ;;  %v21_v0 = vld [vmem:[#allocation2] sm:$0xff]  ;;  %v22_v1 = vld [vmem:[#allocation2 + $0x8] sm:$0xff] }
   0xe   :  { %s34_s12 = sshll.u32 %s90_s11, 4  ;;  %v24_v2 = vmul.f32 0.33333334, %v21_v0  ;;  %v25_v3 = vmul.f32 0.33333334, %v22_v1  ;;  %s35_s12 = int_to_ptr.vmem [resolvable:$true] %s34_s12 }
   0xf   :  { %s65_s13 = scalar_lea.vmem %s35_s12, 256  ;;  %p70_p6 = scmp.lt.s32.totalorder %s35_s12, %s35_s12 }
  0x10   :  { %26 = vst [vmem:[#allocation5] sm:$0xff] %v24_v2  ;;  %27 = vst [vmem:[#allocation5 + $0x8] sm:$0xff] %v25_v3  ;;  %p66_p5 = scmp.ne.s32.totalorder %s35_s12, %s65_s13  ;;  %p71_p7 = scmp.lt.s32.totalorder %s65_s13, %s65_s13 }
  0x12   :  { %p72_p8 = por %p71_p7, %p70_p6 }
  0x14   :  { %p73_p9 = pnand %p72_p8, %p66_p5 }
  0x16   :  { %76 = shalt.err (!%p73_p9)
}
  0x17   :  { %37 = dma.vmem_to_hbm [thread:$0]  %s35_s12, 256, %s108_s1, [#allocation4]  }
  0x18   :  { %87 = dma.done.wait [#allocation4], 256  }
  0x19   :  { %88 = vsyncadd [#allocation4], 4294967040 }
  0x1a   :  { %41 = vsyncpa [#allocation3], 1 }
  0x1b   :  { %42 = vsyncpa [#allocation4], 1 }

</bundles_post_ra>
